<compile_context>
chip_gen: v5e
topology: v5e:2x2
jax: 0.10.0
libtpu: 0.0.40
codegen_flags: <defaults>
</compile_context>

<pallas_src>
import functools

import jax
import jax.numpy as jnp
from jax.experimental import pallas as pl
from jax.experimental.pallas import tpu as pltpu

_IGNORE_INDEX = 255
_DICE_SMOOTH = 1e-6
_TARGET_TILE_ROWS = 1024  # ~128K pixels / tile: << VMEM on v5e/v6e/v7x, amortizes grid overhead


def _pick_tile_rows(total_rows, target=_TARGET_TILE_ROWS):
    """Largest multiple-of-8 divisor of total_rows that is <= target.

    Falls back to a single tile (total_rows) when no such divisor exists or
    when the whole pixel axis already fits in one tile.
    """
    if total_rows <= target:
        return total_rows
    best = total_rows
    for r in range(8, target + 1, 8):
        if total_rows % r == 0:
            best = r
    return best


def _loss_partials_kernel(logit_ref, label_ref, out_ref, *, num_classes,
                          ignore_index):
    """Reduce one (1, C, R, L) logit tile + (1, R, L) label tile to 5 scalars.

    Output tile is (1, 1, 8, 128); sublane rows carry:
      0: sum of per-pixel cross-entropy over non-ignored pixels
      1: number of non-ignored pixels
      2: sum of BCE-with-logits vs one-hot target over all C*pixels elements
      3: sum of softmax probability at the labelled class (dice tp)
      4: number of pixels whose label is a real class (dice sum(one_hot))
    """
    lbl = label_ref[0]                              # (R, L) int32
    valid = lbl != ignore_index                     # (R, L) bool

    # Running max over the (small, statically unrolled) class axis.
    m = logit_ref[0, 0].astype(jnp.float32)
    for c in range(1, num_classes):
        m = jnp.maximum(m, logit_ref[0, c].astype(jnp.float32))

    sumex = jnp.zeros_like(m)
    picked = jnp.zeros_like(m)       # x[label] where label is a real class, else 0
    bce_elt = jnp.zeros_like(m)      # relu(x) + softplus(-|x|), summed over classes
    has_cls = jnp.zeros_like(valid)  # label in [0, num_classes)
    for c in range(num_classes):
        xc = logit_ref[0, c].astype(jnp.float32)
        sumex = sumex + jnp.exp(xc - m)
        hit = lbl == c
        picked = picked + jnp.where(hit, xc, 0.0)
        has_cls = jnp.logical_or(has_cls, hit)
        bce_elt = bce_elt + (jnp.maximum(xc, 0.0)
                             + jnp.log(1.0 + jnp.exp(-jnp.abs(xc))))

    lse = m + jnp.log(sumex)                                        # (R, L)
    ce_sum = jnp.sum(jnp.where(valid, lse - picked, 0.0))
    cnt = jnp.sum(valid.astype(jnp.float32))
    # BCE vs one-hot: sum(relu(x) + softplus(-|x|)) - sum(x * onehot)
    bce_sum = jnp.sum(bce_elt) - jnp.sum(picked)
    # softmax probability of the labelled class (never materializes full softmax)
    tp = jnp.sum(jnp.where(has_cls, jnp.exp(picked - lse), 0.0))
    st = jnp.sum(has_cls.astype(jnp.float32))

    row = jax.lax.broadcasted_iota(jnp.int32, (1, 1, 8, 128), 2)
    tile = jnp.where(row == 0, ce_sum,
           jnp.where(row == 1, cnt,
           jnp.where(row == 2, bce_sum,
           jnp.where(row == 3, tp,
           jnp.where(row == 4, st, 0.0)))))
    out_ref[...] = tile


@jax.jit
def _loss_partials(logits4, labels3):
    """logits4: (N, C, Rtot, L) float, labels3: (N, Rtot, L) int32.

    Returns five (N,) f32 arrays: ce_sum, valid_count, bce_sum, dice_tp, dice_st.
    """
    N, C, Rtot, L = logits4.shape
    R = _pick_tile_rows(Rtot) if L == 128 else Rtot
    KT = Rtot // R

    kernel = functools.partial(_loss_partials_kernel, num_classes=C,
                               ignore_index=_IGNORE_INDEX)
    out = pl.pallas_call(
        kernel,
        out_shape=jax.ShapeDtypeStruct((N, KT, 8, 128), jnp.float32),
        grid_spec=pltpu.PrefetchScalarGridSpec(
            num_scalar_prefetch=0,
            grid=(N, KT),
            in_specs=[
                pl.BlockSpec((1, C, R, L), lambda i, k: (i, 0, k, 0)),
                pl.BlockSpec((1, R, L), lambda i, k: (i, k, 0)),
            ],
            out_specs=pl.BlockSpec((1, 1, 8, 128), lambda i, k: (i, k, 0, 0)),
        ),
        compiler_params=pltpu.CompilerParams(
            dimension_semantics=("parallel", "parallel")),
    )(logits4, labels3)

    sums = jnp.sum(out[:, :, :, 0], axis=1)   # (N, 8) tiny XLA reduce over tiles
    return sums[:, 0], sums[:, 1], sums[:, 2], sums[:, 3], sums[:, 4]


def criterion(img, label, num_classes=2, flag="ce", use_dice=False,
              alpha=0.5, gamma=2):
    """JAX/Pallas re-implementation of Seg/utils/my_loss.criterion."""
    N, C, H, W = img.shape
    assert C == num_classes
    P = H * W
    if P % 128 == 0:
        Rtot, L = P // 128, 128
    else:
        Rtot, L = 1, P   # fallback: whole pixel axis on lanes in one tile

    # Free reshapes (native NCHW order is preserved; no transpose, no upcast).
    logits4 = img.reshape(N, C, Rtot, L)
    labels3 = label.reshape(N, Rtot, L).astype(jnp.int32)

    ce_s, cnt, bce_s, tp, st = _loss_partials(logits4, labels3)
    si = jnp.float32(P)   # sum of softmax over classes & pixels is exactly P

    if flag == "ce":
        # F.cross_entropy: mean over non-ignored pixels
        loss = jnp.sum(ce_s) / jnp.sum(cnt)
    elif flag == "focal":
        mean_ce = jnp.sum(ce_s) / jnp.sum(cnt)
        log_pt = -mean_ce
        pt = jnp.exp(log_pt)
        loss = -alpha * (1.0 - pt) ** gamma * log_pt
    elif flag == "bce":
        # F.binary_cross_entropy_with_logits: mean over all N*C*H*W elements
        loss = jnp.sum(bce_s) / float(N * C * H * W)
    else:
        raise ValueError(f"unknown loss flag: {flag}")

    if use_dice:
        fp = si - tp
        fn = st - tp
        score = (2.0 * tp + _DICE_SMOOTH) / (2.0 * tp + fp + fn + _DICE_SMOOTH)
        loss = loss + (1.0 - jnp.sum(score) / N)
    return loss


class LOSS:
    """Mirror of the PyTorch LOSS nn.Module (no learnable parameters)."""

    def __init__(self, num_classes=2, loss_type="ce", use_dice=False):
        self.num_classes = num_classes
        self.type = loss_type
        self.use_dice = use_dice

    def __call__(self, img, label):
        return criterion(img, label, self.num_classes, self.type, self.use_dice)


def _reference(img, label, num_classes, flag, use_dice, alpha=0.5, gamma=2):
    """Pure-JAX reference mirroring the PyTorch module (for a quiet sanity check)."""
    x = jnp.transpose(img.astype(jnp.float32), (0, 2, 3, 1))      # (N,H,W,C)
    N = x.shape[0]
    lbl = label.astype(jnp.int32)
    lse = jax.scipy.special.logsumexp(x, axis=-1)
    onehot = jax.nn.one_hot(lbl, num_classes, dtype=jnp.float32)  # zero row for 255
    picked = jnp.sum(x * onehot, axis=-1)
    valid = lbl != _IGNORE_INDEX
    ce_mean = jnp.sum(jnp.where(valid, lse - picked, 0.0)) / jnp.sum(valid)
    if flag == "ce":
        loss = ce_mean
    elif flag == "focal":
        log_pt = -ce_mean
        pt = jnp.exp(log_pt)
        loss = -alpha * (1.0 - pt) ** gamma * log_pt
    elif flag == "bce":
        bce = (jnp.maximum(x, 0.0) - x * onehot
               + jnp.log(1.0 + jnp.exp(-jnp.abs(x))))
        loss = jnp.mean(bce)
    else:
        raise ValueError(flag)
    if use_dice:
        sm = jax.nn.softmax(x, axis=-1)
        tp = jnp.sum(sm * onehot, axis=(1, 2, 3))
        fp = jnp.sum(sm, axis=(1, 2, 3)) - tp
        fn = jnp.sum(onehot, axis=(1, 2, 3)) - tp
        score = (2.0 * tp + _DICE_SMOOTH) / (2.0 * tp + fp + fn + _DICE_SMOOTH)
        loss = loss + (1.0 - jnp.sum(score) / N)
    return loss


if __name__ == "__main__":
    key = jax.random.PRNGKey(0)
    k_logits, k_labels, k_ign = jax.random.split(key, 3)

    N, C, H, W = 2, 2, 16, 16
    img = jax.random.normal(k_logits, (N, C, H, W), dtype=jnp.float32)
    label = jax.random.randint(k_labels, (N, H, W), 0, C, dtype=jnp.int32)
    # sprinkle a few ignore_index pixels (handled by the ce/focal path)
    ign_mask = jax.random.uniform(k_ign, (N, H, W)) < 0.05
    label_with_ignore = jnp.where(ign_mask, _IGNORE_INDEX, label)

    # default module: ce loss, no dice
    loss_default = LOSS()(img, label_with_ignore)
    # exercise the other branches as well
    loss_focal_dice = LOSS(num_classes=C, loss_type="focal", use_dice=True)(
        img, label_with_ignore)
    loss_bce = LOSS(num_classes=C, loss_type="bce")(img, label)

    jax.block_until_ready((loss_default, loss_focal_dice, loss_bce))

    # quiet correctness check against a pure-JAX reference
    for got, args in (
        (loss_default, (img, label_with_ignore, C, "ce", False)),
        (loss_focal_dice, (img, label_with_ignore, C, "focal", True)),
        (loss_bce, (img, label, C, "bce", False)),
    ):
        want = _reference(*args)
        assert float(jnp.abs(got - want)) < 1e-3 + 1e-3 * float(jnp.abs(want))

    print("KERNEL_OK")
</pallas_src>

<mosaic_0001>
module attributes {stable_mosaic.version = 11 : i64} {
  func.func @_loss_partials_kernel(%arg0: i32, %arg1: i32, %arg2: memref<1x2x2x128xf32, #tpu.memory_space<vmem>>, %arg3: memref<1x2x128xi32, #tpu.memory_space<vmem>>, %arg4: memref<1x1x8x128xf32, #tpu.memory_space<vmem>>) attributes {dimension_semantics = [#tpu.dimension_semantics<parallel>, #tpu.dimension_semantics<parallel>], iteration_bounds = array<i64: 2, 1>, scalar_prefetch = 0 : i64, scratch_operands = 0 : i64, tpu.core_type = #tpu.core_type<tc>, window_params = [{transform_indices = @transform_0, window_bounds = array<i64: 1, 2, 2, 128>}, {transform_indices = @transform_1, window_bounds = array<i64: 1, 2, 128>}, {transform_indices = @transform_2, window_bounds = array<i64: 1, 1, 8, 128>}]} {
    %c0 = arith.constant 0 : index
    %c0_0 = arith.constant 0 : index
    %c0_1 = arith.constant 0 : index
    %0 = vector.load %arg3[%c0, %c0_0, %c0_1] : memref<1x2x128xi32, #tpu.memory_space<vmem>>, vector<1x2x128xi32>
    %1 = vector.shape_cast %0 : vector<1x2x128xi32> to vector<2x128xi32>
    %c255_i32 = arith.constant 255 : i32
    %2 = vector.broadcast %c255_i32 : i32 to vector<2x128xi32>
    %3 = arith.cmpi ne, %1, %2 : vector<2x128xi32>
    %c0_2 = arith.constant 0 : index
    %c0_3 = arith.constant 0 : index
    %c0_4 = arith.constant 0 : index
    %c0_5 = arith.constant 0 : index
    %4 = vector.load %arg2[%c0_2, %c0_3, %c0_4, %c0_5] : memref<1x2x2x128xf32, #tpu.memory_space<vmem>>, vector<1x1x2x128xf32>
    %5 = vector.shape_cast %4 : vector<1x1x2x128xf32> to vector<2x128xf32>
    %c0_6 = arith.constant 0 : index
    %c1 = arith.constant 1 : index
    %c0_7 = arith.constant 0 : index
    %c0_8 = arith.constant 0 : index
    %6 = vector.load %arg2[%c0_6, %c1, %c0_7, %c0_8] : memref<1x2x2x128xf32, #tpu.memory_space<vmem>>, vector<1x1x2x128xf32>
    %7 = vector.shape_cast %6 : vector<1x1x2x128xf32> to vector<2x128xf32>
    %8 = arith.maximumf %5, %7 : vector<2x128xf32>
    %cst = arith.constant 0.000000e+00 : f32
    %9 = vector.broadcast %cst : f32 to vector<2x128xf32>
    %cst_9 = arith.constant 0.000000e+00 : f32
    %10 = vector.broadcast %cst_9 : f32 to vector<2x128xf32>
    %cst_10 = arith.constant 0.000000e+00 : f32
    %11 = vector.broadcast %cst_10 : f32 to vector<2x128xf32>
    %false = arith.constant false
    %12 = vector.broadcast %false : i1 to vector<2x128xi1>
    %c0_11 = arith.constant 0 : index
    %c0_12 = arith.constant 0 : index
    %c0_13 = arith.constant 0 : index
    %c0_14 = arith.constant 0 : index
    %13 = vector.load %arg2[%c0_11, %c0_12, %c0_13, %c0_14] : memref<1x2x2x128xf32, #tpu.memory_space<vmem>>, vector<1x1x2x128xf32>
    %14 = vector.shape_cast %13 : vector<1x1x2x128xf32> to vector<2x128xf32>
    %15 = arith.subf %14, %8 : vector<2x128xf32>
    %16 = math.exp %15 : vector<2x128xf32>
    %17 = arith.addf %9, %16 : vector<2x128xf32>
    %c0_i32 = arith.constant 0 : i32
    %18 = vector.broadcast %c0_i32 : i32 to vector<2x128xi32>
    %19 = arith.cmpi eq, %1, %18 : vector<2x128xi32>
    %cst_15 = arith.constant 0.000000e+00 : f32
    %20 = vector.broadcast %cst_15 : f32 to vector<2x128xf32>
    %21 = arith.select %19, %14, %20 : vector<2x128xi1>, vector<2x128xf32>
    %22 = arith.addf %10, %21 : vector<2x128xf32>
    %23 = arith.ori %12, %19 : vector<2x128xi1>
    %cst_16 = arith.constant 0.000000e+00 : f32
    %24 = vector.broadcast %cst_16 : f32 to vector<2x128xf32>
    %25 = arith.maximumf %14, %24 : vector<2x128xf32>
    %26 = math.absf %14 : vector<2x128xf32>
    %cst_17 = arith.constant 0.000000e+00 : f32
    %27 = vector.broadcast %cst_17 : f32 to vector<2x128xf32>
    %28 = arith.subf %27, %26 : vector<2x128xf32>
    %29 = math.exp %28 : vector<2x128xf32>
    %cst_18 = arith.constant 1.000000e+00 : f32
    %30 = vector.broadcast %cst_18 : f32 to vector<2x128xf32>
    %31 = arith.addf %30, %29 : vector<2x128xf32>
    %32 = math.log %31 : vector<2x128xf32>
    %33 = arith.addf %25, %32 : vector<2x128xf32>
    %34 = arith.addf %11, %33 : vector<2x128xf32>
    %c0_19 = arith.constant 0 : index
    %c1_20 = arith.constant 1 : index
    %c0_21 = arith.constant 0 : index
    %c0_22 = arith.constant 0 : index
    %35 = vector.load %arg2[%c0_19, %c1_20, %c0_21, %c0_22] : memref<1x2x2x128xf32, #tpu.memory_space<vmem>>, vector<1x1x2x128xf32>
    %36 = vector.shape_cast %35 : vector<1x1x2x128xf32> to vector<2x128xf32>
    %37 = arith.subf %36, %8 : vector<2x128xf32>
    %38 = math.exp %37 : vector<2x128xf32>
    %39 = arith.addf %17, %38 : vector<2x128xf32>
    %c1_i32 = arith.constant 1 : i32
    %40 = vector.broadcast %c1_i32 : i32 to vector<2x128xi32>
    %41 = arith.cmpi eq, %1, %40 : vector<2x128xi32>
    %cst_23 = arith.constant 0.000000e+00 : f32
    %42 = vector.broadcast %cst_23 : f32 to vector<2x128xf32>
    %43 = arith.select %41, %36, %42 : vector<2x128xi1>, vector<2x128xf32>
    %44 = arith.addf %22, %43 : vector<2x128xf32>
    %45 = arith.ori %23, %41 : vector<2x128xi1>
    %cst_24 = arith.constant 0.000000e+00 : f32
    %46 = vector.broadcast %cst_24 : f32 to vector<2x128xf32>
    %47 = arith.maximumf %36, %46 : vector<2x128xf32>
    %48 = math.absf %36 : vector<2x128xf32>
    %cst_25 = arith.constant 0.000000e+00 : f32
    %49 = vector.broadcast %cst_25 : f32 to vector<2x128xf32>
    %50 = arith.subf %49, %48 : vector<2x128xf32>
    %51 = math.exp %50 : vector<2x128xf32>
    %cst_26 = arith.constant 1.000000e+00 : f32
    %52 = vector.broadcast %cst_26 : f32 to vector<2x128xf32>
    %53 = arith.addf %52, %51 : vector<2x128xf32>
    %54 = math.log %53 : vector<2x128xf32>
    %55 = arith.addf %47, %54 : vector<2x128xf32>
    %56 = arith.addf %34, %55 : vector<2x128xf32>
    %57 = math.log %39 : vector<2x128xf32>
    %58 = arith.addf %8, %57 : vector<2x128xf32>
    %59 = arith.subf %58, %44 : vector<2x128xf32>
    %cst_27 = arith.constant 0.000000e+00 : f32
    %60 = vector.broadcast %cst_27 : f32 to vector<2x128xf32>
    %61 = arith.select %3, %59, %60 : vector<2x128xi1>, vector<2x128xf32>
    %62 = vector.shape_cast %61 : vector<2x128xf32> to vector<1x2x128xf32>
    %cst_28 = arith.constant dense<0.000000e+00> : vector<1xf32>
    %63 = vector.multi_reduction <add>, %62, %cst_28 [1, 2] : vector<1x2x128xf32> to vector<1xf32>
    %64 = vector.shape_cast %63 : vector<1xf32> to vector<1x1x1xf32>
    %65 = vector.extract %64[0, 0, 0] : f32 from vector<1x1x1xf32>
    %66 = arith.extui %3 : vector<2x128xi1> to vector<2x128xi32>
    %67 = arith.sitofp %66 : vector<2x128xi32> to vector<2x128xf32>
    %68 = vector.shape_cast %67 : vector<2x128xf32> to vector<1x2x128xf32>
    %cst_29 = arith.constant dense<0.000000e+00> : vector<1xf32>
    %69 = vector.multi_reduction <add>, %68, %cst_29 [1, 2] : vector<1x2x128xf32> to vector<1xf32>
    %70 = vector.shape_cast %69 : vector<1xf32> to vector<1x1x1xf32>
    %71 = vector.extract %70[0, 0, 0] : f32 from vector<1x1x1xf32>
    %72 = vector.shape_cast %56 : vector<2x128xf32> to vector<1x2x128xf32>
    %cst_30 = arith.constant dense<0.000000e+00> : vector<1xf32>
    %73 = vector.multi_reduction <add>, %72, %cst_30 [1, 2] : vector<1x2x128xf32> to vector<1xf32>
    %74 = vector.shape_cast %73 : vector<1xf32> to vector<1x1x1xf32>
    %75 = vector.extract %74[0, 0, 0] : f32 from vector<1x1x1xf32>
    %76 = vector.shape_cast %44 : vector<2x128xf32> to vector<1x2x128xf32>
    %cst_31 = arith.constant dense<0.000000e+00> : vector<1xf32>
    %77 = vector.multi_reduction <add>, %76, %cst_31 [1, 2] : vector<1x2x128xf32> to vector<1xf32>
    %78 = vector.shape_cast %77 : vector<1xf32> to vector<1x1x1xf32>
    %79 = vector.extract %78[0, 0, 0] : f32 from vector<1x1x1xf32>
    %80 = arith.subf %75, %79 : f32
    %81 = arith.subf %44, %58 : vector<2x128xf32>
    %82 = math.exp %81 : vector<2x128xf32>
    %cst_32 = arith.constant 0.000000e+00 : f32
    %83 = vector.broadcast %cst_32 : f32 to vector<2x128xf32>
    %84 = arith.select %45, %82, %83 : vector<2x128xi1>, vector<2x128xf32>
    %85 = vector.shape_cast %84 : vector<2x128xf32> to vector<1x2x128xf32>
    %cst_33 = arith.constant dense<0.000000e+00> : vector<1xf32>
    %86 = vector.multi_reduction <add>, %85, %cst_33 [1, 2] : vector<1x2x128xf32> to vector<1xf32>
    %87 = vector.shape_cast %86 : vector<1xf32> to vector<1x1x1xf32>
    %88 = vector.extract %87[0, 0, 0] : f32 from vector<1x1x1xf32>
    %89 = arith.extui %45 : vector<2x128xi1> to vector<2x128xi32>
    %90 = arith.sitofp %89 : vector<2x128xi32> to vector<2x128xf32>
    %91 = vector.shape_cast %90 : vector<2x128xf32> to vector<1x2x128xf32>
    %cst_34 = arith.constant dense<0.000000e+00> : vector<1xf32>
    %92 = vector.multi_reduction <add>, %91, %cst_34 [1, 2] : vector<1x2x128xf32> to vector<1xf32>
    %93 = vector.shape_cast %92 : vector<1xf32> to vector<1x1x1xf32>
    %94 = vector.extract %93[0, 0, 0] : f32 from vector<1x1x1xf32>
    %95 = tpu.iota {dimensions = array<i32: 2>} : vector<1x1x8x128xi32>
    %c0_i32_35 = arith.constant 0 : i32
    %96 = vector.broadcast %c0_i32_35 : i32 to vector<1x1x8x128xi32>
    %97 = arith.cmpi eq, %95, %96 : vector<1x1x8x128xi32>
    %c1_i32_36 = arith.constant 1 : i32
    %98 = vector.broadcast %c1_i32_36 : i32 to vector<1x1x8x128xi32>
    %99 = arith.cmpi eq, %95, %98 : vector<1x1x8x128xi32>
    %c2_i32 = arith.constant 2 : i32
    %100 = vector.broadcast %c2_i32 : i32 to vector<1x1x8x128xi32>
    %101 = arith.cmpi eq, %95, %100 : vector<1x1x8x128xi32>
    %c3_i32 = arith.constant 3 : i32
    %102 = vector.broadcast %c3_i32 : i32 to vector<1x1x8x128xi32>
    %103 = arith.cmpi eq, %95, %102 : vector<1x1x8x128xi32>
    %c4_i32 = arith.constant 4 : i32
    %104 = vector.broadcast %c4_i32 : i32 to vector<1x1x8x128xi32>
    %105 = arith.cmpi eq, %95, %104 : vector<1x1x8x128xi32>
    %cst_37 = arith.constant 0.000000e+00 : f32
    %106 = vector.broadcast %94 : f32 to vector<1x1x8x128xf32>
    %107 = vector.broadcast %cst_37 : f32 to vector<1x1x8x128xf32>
    %108 = arith.select %105, %106, %107 : vector<1x1x8x128xi1>, vector<1x1x8x128xf32>
    %109 = vector.broadcast %88 : f32 to vector<1x1x8x128xf32>
    %110 = arith.select %103, %109, %108 : vector<1x1x8x128xi1>, vector<1x1x8x128xf32>
    %111 = vector.broadcast %80 : f32 to vector<1x1x8x128xf32>
    %112 = arith.select %101, %111, %110 : vector<1x1x8x128xi1>, vector<1x1x8x128xf32>
    %113 = vector.broadcast %71 : f32 to vector<1x1x8x128xf32>
    %114 = arith.select %99, %113, %112 : vector<1x1x8x128xi1>, vector<1x1x8x128xf32>
    %115 = vector.broadcast %65 : f32 to vector<1x1x8x128xf32>
    %116 = arith.select %97, %115, %114 : vector<1x1x8x128xi1>, vector<1x1x8x128xf32>
    %c0_38 = arith.constant 0 : index
    %c0_39 = arith.constant 0 : index
    %c0_40 = arith.constant 0 : index
    %c0_41 = arith.constant 0 : index
    %117 = vector.load %arg4[%c0_38, %c0_39, %c0_40, %c0_41] : memref<1x1x8x128xf32, #tpu.memory_space<vmem>>, vector<1x1x8x128xf32>
    tpu.vector_store %arg4[%c0_38, %c0_39, %c0_40, %c0_41], %116 {strides = array<i32>} : memref<1x1x8x128xf32, #tpu.memory_space<vmem>>, vector<1x1x8x128xf32>,
    return
  }
  func.func @transform_0(%arg0: i32, %arg1: i32) -> (i32, i32, i32, i32) {
    %c0_i32 = arith.constant 0 : i32
    %c0_i32_0 = arith.constant 0 : i32
    %c0_i32_1 = arith.constant 0 : i32
    return %arg0, %c0_i32, %arg1, %c0_i32_0 : i32, i32, i32, i32
  }
  func.func @transform_1(%arg0: i32, %arg1: i32) -> (i32, i32, i32) {
    %c0_i32 = arith.constant 0 : i32
    %c0_i32_0 = arith.constant 0 : i32
    return %arg0, %arg1, %c0_i32 : i32, i32, i32
  }
  func.func @transform_2(%arg0: i32, %arg1: i32) -> (i32, i32, i32, i32) {
    %c0_i32 = arith.constant 0 : i32
    %c0_i32_0 = arith.constant 0 : i32
    %c0_i32_1 = arith.constant 0 : i32
    return %arg0, %arg1, %c0_i32, %c0_i32_0 : i32, i32, i32, i32
  }
}

</mosaic_0001>

<bundles_post_ra>
// kernel: _loss_partials.1
= control target key start
LH: loop header
LB: loop body
LE: loop exit
PB: predicated region body
PF: predicated region fallthrough
CT: control target
= control target key end

     0   :  { %7 = vsyncpa [#allocation3], 0  ;;  %s830_s0 = inlined_call_operand.hbm [shape: f32[2,2,2,128], index: 0, kind: input, shape index: {}]   ;;  %s831_s1 = inlined_call_operand.hbm [shape: s32[2,2,128], index: 1, kind: input, shape index: {}]   ;;  %s832_s2 = inlined_call_operand.vmem [shape: f32[2,1,8,128], index: 2, kind: output, shape index: {}]  }
   0x1   :  { %9 = vsyncpa [#allocation3 + $0x1], 0 }
   0x2   :  { %10 = vsyncpa [#allocation5], 0 }
   0x3   :  { %12 = vsyncpa [#allocation5 + $0x1], 0  ;;  %s716_s9 = smov 0   ;;  %s718_s10 = smov 0  }
   0x4   :  { %s720_s11 = smov 0   ;;  %s722_s12 = smov 0  }
   0x5   :  { %s724_s13 = smov 0   ;;  %s726_s14 = smov 0  }
   0x6 LB: > { %s472_s15 = sadd.s32 4294967295, %s696_s14   ;;  %s30_s16 = sadd.s32 1, %s692_s13  ;;  %s696_s14 = sphi %s726_s14, %s18_s14   ;;  %s692_s13 = sphi %s724_s13, %s840_s13   ;;  %s688_s12 = sphi %s722_s12, %s839_s12   ;;  %s684_s11 = sphi %s720_s11, %s838_s11   ;;  %s680_s10 = sphi %s718_s10, %s837_s10   ;;  %s676_s9 = sphi %s716_s9, %s836_s9  }
   0x7   : > { %p32_p0 = scmp.ge.s32.totalorder %s30_s16, 2  ;;  %s39_s17 = sadd.s32 1, %s684_s11 }
   0x8   : > { %p46_p1 = scmp.ne.s32.totalorder %s684_s11, %s680_s10  ;;  %p47_p2 = scmp.eq.s32.totalorder %s696_s14, 0 }
   0x9   : > { %s842_s16 = smov (%p32_p0, %s30_s16), 0  ;;  %p52_p4 = scmp.ne.s32.totalorder %s680_s10, %s676_s9 }
   0xa   : > { %p752_p3 = por %p47_p2, %p46_p1  ;;  %s34_s19 = ssub.s32 %s692_s13, %s842_s16 }
   0xb   : > { %p53_p5 = scmp.eq.s32.totalorder %s472_s15, 0  ;;  %p37_p6 = scmp.eq.s32.totalorder %s34_s19, 0 }
   0xc   : > { %p514_p8 = scmp.lt.s32.totalorder %s696_s14, 2  ;;  %s132_s22 = sand.u32 1, %s684_s11  }
   0xd   : > { %p759_p7 = por %p53_p5, %p52_p4  ;;  %s490_s23 = sshll.u32 %s692_s13, 2 }
   0xe   : > { %s765_s21 = scalar_select %p37_p6, %s684_s11, %s39_s17  }
   0xf   : > { %s476_s24 = sshll.u32 %s132_s22, 2  ;;  %s142_s27 = scalar_lea.hbm %s830_s0, %s490_s23 }
  0x10   : > { %s143_s28 = sshll.u32 %s142_s27, 4  ;;  %s136_s29 = scalar_lea.vmem [#allocation2], %s476_s24  ;;  %s144_s28 = int_to_ptr.hbm [resolvable:$true] %s143_s28 }
  0x11   : > { %s145_s30 = sshll.u32 %s136_s29, 4  ;;  %p774_p9 = pnand %p514_p8, %p752_p3  ;;  %s146_s30 = int_to_ptr.vmem [resolvable:$true] %s145_s30 }
  0x12   : > { %p481_p10 = scmp.ge.s32.totalorder %s696_s14, 1  ;;  %p173_p11 = scmp.lt.s32.totalorder %s696_s14, 3 }
  0x13   : > { %s133_s4 = scalar_lea.sflag [#allocation3], %s132_s22  ;;  %s698_s5 = smov 32  }
  0x14   : > { %s699_s6 = smov 2   ;;  %p174_p12 = pnand %p481_p10, %p173_p11 }
  0x15   : > { %510 = dma.hbm_to_vmem [thread:$0]  (!%p774_p9), %s144_s28, 64, %s146_s30, %s133_s4, %s698_s5, %s698_s5, %s699_s6  }
  0x16   : > { %s479_s7 = sshll.u32 %s132_s22, 1  ;;  %s480_s8 = sshll.u32 %s692_s13, 1 }
  0x17   : > { %s164_s17 = scalar_lea.hbm %s831_s1, %s480_s8  ;;  %s159_s19 = scalar_lea.vmem [#allocation4], %s479_s7 }
  0x18   : > { %s166_s18 = sshll.u32 %s164_s17, 4  ;;  %s168_s23 = sshll.u32 %s159_s19, 4  ;;  %s167_s18 = int_to_ptr.hbm [resolvable:$true] %s166_s18  ;;  %s169_s23 = int_to_ptr.vmem [resolvable:$true] %s168_s23 }
  0x19   : > { %s156_s24 = scalar_lea.sflag [#allocation5], %s132_s22  ;;  %177 = sbr.rel (%p174_p12) target bundleno = 270 (0x10e), region = 28 }
  0x1a   : > { %513 = dma.hbm_to_vmem [thread:$0]  (!%p774_p9), %s167_s18, 32, %s169_s23, %s156_s24  }
  0x1b   : > { %s179_s25 = sand.u32 (!%p174_p12), 1, %s680_s10  }
  0x1c   : > { %s482_s26 = sshll.u32 (!%p174_p12), %s179_s25, 2  ;;  %s180_s27 = scalar_lea.sflag (!%p174_p12), [#allocation3], %s179_s25 }
  0x1d   : > { %s183_s28 = scalar_lea.vmem (!%p174_p12), [#allocation2], %s482_s26 }
  0x1e   : > { %667 = dma.done.wait (%p759_p7), %s180_s27, 64  }
  0x1f   : > { %669 = vsyncadd (%p759_p7), %s180_s27, 4294967232  ;;  %s483_s29 = sshll.u32 %s179_s25, 1  ;;  %s190_s30 = scalar_lea.sflag [#allocation5], %s179_s25 }
  0x20   : > { %s193_s4 = scalar_lea.vmem [#allocation4], %s483_s29 }
  0x21   : > { %671 = dma.done.wait (%p759_p7), %s190_s30, 32  }
  0x22   : > { %673 = vsyncadd (%p759_p7), %s190_s30, 4294967264  ;;  %v231_v0 = vld [vmem:[%s183_s28] sm:$0x3]  ;;  %v485_v1 = vld [vmem:[%s183_s28 + $0x2] sm:$0x3]  ;;  %vm275_vm2 = vcmask 1041408  }
  0x23   : > { %v243_v2 = vand.u32 2147483647, %v231_v0  ;;  %v261_v3 = vand.u32 2147483647, %v485_v1  ;;  %v234_v4 = vmax.f32 %v231_v0, %v485_v1  ;;  %v229_v19 = vld [vmem:[%s193_s4] sm:$0x3] }
  0x24   : > { %vm239_vm0 = vcmp.eq.s32.totalorder %v229_v19, 0  ;;  %vm256_vm1 = vcmp.eq.s32.totalorder %v229_v19, 1  ;;  %v242_v21 = vmax.f32 %v231_v0, 0.0  ;;  %v260_v23 = vmax.f32 %v485_v1, 0.0  ;;  %p222_p13 = scmp.lt.s32.totalorder %s688_s12, 1 }
  0x25   : > { %v244_v5 = vsub.f32 0.0, %v243_v2  ;;  %v262_v6 = vsub.f32 0.0, %v261_v3  ;;  %v235_v7 = vsub.f32 %v231_v0, %v234_v4  ;;  %v252_v8 = vsub.f32 %v485_v1, %v234_v4  ;;  %vm259_vm4 = vmor %vm239_vm0, %vm256_vm1 }
  0x26   : > { %v240_v26 = vsel %vm239_vm0, %v231_v0, 0.0  ;;  %v257_v27 = vsel %vm256_vm1, %v485_v1, 0.0  ;;  %vm230_vm3 = vcmp.ne.s32.totalorder %v229_v19, 255  ;;  %v700_v43 = vmov 0.0   ;;  %s844_s12 = smov (!%p222_p13, %s688_s12), 1 }
  0x27   : > { %v245_v9 = vmul.f32 1.442695, %v244_v5  ;;  %v263_v10 = vmul.f32 1.442695, %v262_v6  ;;  %v236_v11 = vmul.f32 1.442695, %v235_v7  ;;  %v258_v32 = vadd.f32 %v257_v27, %v240_v26 }
  0x28   : > { %v253_v12 = vmul.f32 1.442695, %v252_v8  ;;  %v486_v44 = vsel %vm230_vm3, 1.0, %v700_v43  ;;  %v487_v49 = vsel %vm259_vm4, 1.0, %v700_v43  ;;  %s484_s9 = sshll.u32 %s844_s12, 3 }
  0x29   : > { %566 = vpow2.f32 %v245_v9  ;;  %v308_v42 = vsel %vm275_vm2, %v258_v32, 0.0  ;;  %v288_v45 = vsel %vm275_vm2, %v486_v44, 0.0  ;;  %v335_v50 = vsel %vm275_vm2, %v487_v49, 0.0  ;;  %s228_s18 = scalar_lea.vmem %s832_s2, %s484_s9 }
  0x2a   : > { %568 = vpow2.f32 %v263_v10 }
  0x2b   : > { %570 = vpow2.f32 %v236_v11 }
  0x2c   : > { %572 = vpow2.f32 %v253_v12 }
  0x2f   : > { %v567_v13 = vpop.eup %566 }
  0x30   : > { %v569_v14 = vpop.eup %568  ;;  %v247_v15 = vadd.f32 1.0, %v567_v13 }
  0x31   : > { %v571_v16 = vpop.eup %570  ;;  %v265_v17 = vadd.f32 1.0, %v569_v14 }
  0x32   : > { %v573_v18 = vpop.eup %572  ;;  %574 = vlog2.f32 %v247_v15 }
  0x33   : > { %576 = vlog2.f32 %v265_v17  ;;  %v255_v20 = vadd.f32 %v573_v18, %v571_v16 }
  0x35   : > { %578 = vlog2.f32 %v255_v20 }
  0x38   : > { %v575_v22 = vpop.eup %574 }
  0x39   : > { %v577_v24 = vpop.eup %576  ;;  %v249_v25 = vmul.f32 0.6931472, %v575_v22 }
  0x3a   : > { %v267_v28 = vmul.f32 0.6931472, %v577_v24 }
  0x3b   : > { %v579_v29 = vpop.eup %578  ;;  %v250_v30 = vadd.f32 %v249_v25, %v242_v21 }
  0x3c   : > { %v268_v31 = vadd.f32 %v267_v28, %v260_v23  ;;  %v271_v33 = vmul.f32 0.6931472, %v579_v29  ;;  %v345_v29 = vlaneseq }
  0x3e   : > { %v269_v34 = vadd.f32 %v268_v31, %v250_v30  ;;  %v272_v35 = vadd.f32 %v271_v33, %v234_v4  ;;  %v346_v30 = vshrl.u32 %v345_v29, 7 }
  0x40   : > { %v298_v36 = vsel %vm275_vm2, %v269_v34, 0.0  ;;  %v273_v37 = vsub.f32 %v272_v35, %v258_v32  ;;  %v319_v38 = vsub.f32 %v258_v32, %v272_v35  ;;  %vm351_vm5 = vcmp.eq.s32.totalorder %v346_v30, 4 }
  0x41   : > { %299 = vadd.xlane.f32.xlu1 %v298_v36  ;;  %vm350_vm6 = vcmp.eq.s32.totalorder %v346_v30, 3  ;;  %vm349_vm7 = vcmp.eq.s32.totalorder %v346_v30, 2  ;;  %vm348_vm8 = vcmp.eq.s32.totalorder %v346_v30, 1  ;;  %vm347_vm9 = vcmp.eq.s32.totalorder %v346_v30, 0 }
  0x42   : > { %v274_v39 = vsel %vm230_vm3, %v273_v37, 0.0  ;;  %v320_v40 = vmul.f32 1.442695, %v319_v38 }
  0x43   : > { %v276_v41 = vsel %vm275_vm2, %v274_v39, 0.0 }
  0x44   : > { %277 = vadd.xlane.f32.xlu0 %v276_v41  ;;  %580 = vpow2.f32 %v320_v40 }
  0x49   : > { %309 = vadd.xlane.f32.xlu1 %v308_v42 }
  0x4a   : > { %v581_v46 = vpop.eup %580 }
  0x4b   : > { %v322_v47 = vsel %vm259_vm4, %v581_v46, 0.0 }
  0x4c   : > { %289 = vadd.xlane.f32.xlu0 %v288_v45  ;;  %v323_v48 = vsel %vm275_vm2, %v322_v47, 0.0 }
  0x4d   : > { %324 = vadd.xlane.f32.xlu2 %v323_v48 }
  0x55   : > { %336 = vadd.xlane.f32.xlu2 %v335_v50 }
  0xb4   : > { %v300_v51 = vpop.xlane.xlu1 %299 }
  0xb5   : > { %v301_v52 = vrot.slane %v300_v51, 4 }
  0xb7   : > { %v278_v53 = vpop.xlane.xlu0 %277  ;;  %v302_v56 = vadd.f32 %v301_v52, %v300_v51 }
  0xb8   : > { %v279_v54 = vrot.slane %v278_v53, 4 }
  0xb9   : > { %v303_v61 = vrot.slane %v302_v56, 2 }
  0xba   : > { %v280_v55 = vadd.f32 %v279_v54, %v278_v53 }
  0xbb   : > { %v304_v9 = vadd.f32 %v303_v61, %v302_v56 }
  0xbc   : > { %v281_v57 = vrot.slane %v280_v55, 2  ;;  %v310_v58 = vpop.xlane.xlu1 %309 }
  0xbd   : > { %v311_v59 = vrot.slane %v310_v58, 4  ;;  %v305_v14 = vrot.slane %v304_v9, 1 }
  0xbe   : > { %v282_v60 = vadd.f32 %v281_v57, %v280_v55 }
  0xbf   : > { %v312_v62 = vadd.f32 %v311_v59, %v310_v58  ;;  %v290_v63 = vpop.xlane.xlu0 %289  ;;  %v306_v23 = vadd.f32 %v305_v14, %v304_v9 }
  0xc0   : > { %v291_v0 = vrot.slane %v290_v63, 4  ;;  %v325_v1 = vpop.xlane.xlu2 %324  ;;  %v283_v2 = vrot.slane %v282_v60, 1 }
  0xc1   : > { %v313_v3 = vrot.slane %v312_v62, 2  ;;  %v326_v4 = vrot.slane %v325_v1, 4 }
  0xc2   : > { %v292_v5 = vadd.f32 %v291_v0, %v290_v63  ;;  %v284_v6 = vadd.f32 %v283_v2, %v282_v60 }
  0xc3   : > { %v314_v7 = vadd.f32 %v313_v3, %v312_v62  ;;  %v327_v8 = vadd.f32 %v326_v4, %v325_v1 }
  0xc4   : > { %v293_v10 = vrot.slane %v292_v5, 2  ;;  %491 = vpush %v284_v6 }
  0xc5   : > { %v328_v11 = vrot.slane %v327_v8, 2  ;;  %v315_v13 = vrot.slane %v314_v7, 1 }
  0xc6   : > { %v294_v12 = vadd.f32 %v293_v10, %v292_v5 }
  0xc7   : > { %v329_v15 = vadd.f32 %v328_v11, %v327_v8  ;;  %v316_v21 = vadd.f32 %v315_v13, %v314_v7 }
  0xc8   : > { %v337_v16 = vpop.xlane.xlu2 %336  ;;  %v295_v17 = vrot.slane %v294_v12, 1 }
  0xc9   : > { %v338_v18 = vrot.slane %v337_v16, 4  ;;  %v330_v19 = vrot.slane %v329_v15, 1 }
  0xca   : > { %v296_v20 = vadd.f32 %v295_v17, %v294_v12 }
  0xcb   : > { %v339_v22 = vadd.f32 %v338_v18, %v337_v16  ;;  %v331_v24 = vadd.f32 %v330_v19, %v329_v15 }
  0xcc   : > { %493 = vpush %v296_v20 }
  0xcd   : > { %v340_v25 = vrot.slane %v339_v22, 2  ;;  %495 = vpush %v306_v23 }
  0xce   : > { %497 = vpush %v316_v21 }
  0xcf   : > { %v341_v26 = vadd.f32 %v340_v25, %v339_v22  ;;  %499 = vpush %v331_v24 }
  0xd1   : > { %v342_v27 = vrot.slane %v341_v26, 1 }
  0xd3   : > { %v343_v28 = vadd.f32 %v342_v27, %v341_v26 }
  0xd5   : > { %501 = vpush %v343_v28 }
  0xf5   : > { %s492_s20 = spop %491 }
  0xf6   : > { %v360_v38 = vstv %s492_s20 }
  0xfd   : > { %s494_s22 = spop %493 }
  0xfe   : > { %s496_s3 = spop %495  ;;  %v358_v36 = vstv %s494_s22 }
  0xff   : > { %s498_s5 = spop %497 }
 0x100   : > { %s318_s6 = ssub.f32 %s496_s3, %s498_s5  ;;  %s500_s7 = spop %499 }
 0x101   : > { %v354_v32 = vstv %s500_s7 }
 0x102   : > { %v356_v34 = vstv %s318_s6 }
 0x106   : > { %s502_s8 = spop %501 }
 0x107   : > { %v352_v31 = vstv %s502_s8 }
 0x108   : > { %v353_v33 = vsel %vm351_vm5, %v352_v31, 0.0 }
 0x109   : > { %v355_v35 = vsel %vm350_vm6, %v354_v32, %v353_v33 }
 0x10a   : > { %v357_v37 = vsel %vm349_vm7, %v356_v34, %v355_v35 }
 0x10b   : > { %v359_v39 = vsel %vm348_vm8, %v358_v36, %v357_v37 }
 0x10c   : > { %v361_v40 = vsel %vm347_vm9, %v360_v38, %v359_v39 }
 0x10d   : > { %362 = vst [vmem:[%s228_s18] sm:$0xff] %v361_v40 }
 0x10e PF: > { %s18_s14 = sadd.s32 1, %s696_s14   ;;  %s836_s9 = smov %s680_s10 }
 0x10f   : > { %p15_p0 = scmp.ge.s32.totalorder %s18_s14, 4   ;;  %s837_s10 = smov %s684_s11 }
 0x110   : > { %s838_s11 = smov %s765_s21  ;;  %s839_s12 = smov %s692_s13 }
 0x111   : > { %s840_s13 = smov %s842_s16  ;;  %17 = sbr.rel (!%p15_p0) target bundleno = 6 (0x6), region = 82 }
 0x116   :  { %388 = vsyncpa [#allocation3], 1 }
 0x117   :  { %390 = vsyncpa [#allocation3 + $0x1], 1 }
 0x118   :  { %391 = vsyncpa [#allocation5], 1 }
 0x119   :  { %393 = vsyncpa [#allocation5 + $0x1], 1 }

</bundles_post_ra>
